<compile_context>
chip_gen: v7x
topology: tpu7x:2x2x1
jax: 0.10.0
libtpu: 0.0.40
codegen_flags: <defaults>
</compile_context>

<pallas_src>
import jax
import jax.numpy as jnp
from jax.experimental import pallas as pl
from jax.experimental.pallas import tpu as pltpu


def _chip_budgets():
    """(per_block_bytes, vmem_limit_bytes) derived from the chip generation."""
    try:
        cap = getattr(pltpu.get_tpu_info(), "vmem_capacity_bytes", None)
    except Exception:
        cap = None
    if not cap:
        cap = 64 * 1024 * 1024                      # conservative: v7x per-TC
    if cap >= 100 * 1024 * 1024:                    # v5e / v6e: 128 MiB VMEM
        return 14 * 1024 * 1024, 64 * 1024 * 1024   # bigger blocks, deep DB
    return 6 * 1024 * 1024, 48 * 1024 * 1024        # v7x: 64 MiB per TC


# ----------------------------- fused single-pass -----------------------------

def _make_fused_kernel(hw_true):
    inv_hw = 1.0 / float(hw_true)

    def kernel(x_ref, w1t_ref, w2t_ref, o_ref):
        # x_ref: (Bt, C, HW) native dtype; w1t: (C, MID) f32; w2t: (MID, C) f32
        x = x_ref[...]
        # Squeeze: f32 accumulation only (no f32 copy of the tile).
        y = jnp.sum(x, axis=2, dtype=jnp.float32) * inv_hw            # (Bt, C)
        # Excitation: Linear -> ReLU -> Linear -> Sigmoid, batched over Bt.
        h = jnp.maximum(
            jnp.dot(y, w1t_ref[...], preferred_element_type=jnp.float32), 0.0)
        z = jnp.dot(h, w2t_ref[...], preferred_element_type=jnp.float32)
        s = jax.nn.sigmoid(z).astype(o_ref.dtype)                      # (Bt, C)
        # Scale: native-dtype multiply, gate broadcast over spatial lanes.
        o_ref[...] = x * s[:, :, None]

    return kernel


# ---------------------- HW-chunked fallback (two passes) ---------------------

def _make_gate_kernel(hw_true, chunk):
    inv_hw = 1.0 / float(hw_true)

    def kernel(x_ref, w1t_ref, w2t_ref, z_ref, acc_ref):
        # x_ref: (1, C, chunk); z_ref: (1, 1, C) f32; acc_ref: (1, C) f32
        k = pl.program_id(1)

        @pl.when(k == 0)
        def _():
            acc_ref[...] = jnp.zeros_like(acc_ref)

        x = x_ref[...]
        # Mask out-of-range lanes of the tail chunk (garbage past HW).
        lane = jax.lax.broadcasted_iota(jnp.int32, x.shape, 2)
        valid = (k * chunk + lane) < hw_true
        acc_ref[...] += jnp.sum(jnp.where(valid, x, 0).astype(jnp.float32),
                                axis=2)

        @pl.when(k == pl.num_programs(1) - 1)
        def _():
            y = acc_ref[...] * inv_hw                                   # (1, C)
            h = jnp.maximum(
                jnp.dot(y, w1t_ref[...], preferred_element_type=jnp.float32),
                0.0)
            z = jnp.dot(h, w2t_ref[...], preferred_element_type=jnp.float32)
            z_ref[...] = jax.nn.sigmoid(z)[:, None, :]                  # (1,1,C)

    return kernel


def _scale_kernel(x_ref, z_ref, o_ref):
    # x_ref/o_ref: (1, C, chunk); z_ref: (1, 1, C) f32 (resident across chunks)
    s = jnp.swapaxes(z_ref[...].astype(o_ref.dtype), 1, 2)  # (1, C, 1)
    o_ref[...] = x_ref[...] * s


def _se_chunked(x_flat, w1t, w2t, hw, per_block_bytes, vmem_limit, donate):
    B, C, HW = x_flat.shape
    itemsize = jnp.dtype(x_flat.dtype).itemsize
    chunk = max(128, (per_block_bytes // (C * itemsize)) // 128 * 128)
    chunk = min(chunk, pl.cdiv(HW, 128) * 128)
    n_k = pl.cdiv(HW, chunk)

    cparams = pltpu.CompilerParams(
        dimension_semantics=("parallel", "arbitrary"),
        vmem_limit_bytes=vmem_limit,
    )

    # Pass 1: chunked channel sums -> excitation -> per-channel gate (B,1,C).
    z = pl.pallas_call(
        _make_gate_kernel(hw, chunk),
        out_shape=jax.ShapeDtypeStruct((B, 1, C), jnp.float32),
        grid_spec=pltpu.PrefetchScalarGridSpec(
            num_scalar_prefetch=0,
            grid=(B, n_k),
            in_specs=[
                pl.BlockSpec((1, C, chunk), lambda b, k: (b, 0, k)),
                pl.BlockSpec(w1t.shape, lambda b, k: (0, 0)),
                pl.BlockSpec(w2t.shape, lambda b, k: (0, 0)),
            ],
            out_specs=pl.BlockSpec((1, 1, C), lambda b, k: (b, 0, 0)),
            scratch_shapes=[pltpu.VMEM((1, C), jnp.float32)],
        ),
        compiler_params=cparams,
    )(x_flat, w1t, w2t)

    # Pass 2: re-stream chunks and apply the gate.
    out = pl.pallas_call(
        _scale_kernel,
        out_shape=jax.ShapeDtypeStruct((B, C, HW), x_flat.dtype),
        grid_spec=pltpu.PrefetchScalarGridSpec(
            num_scalar_prefetch=0,
            grid=(B, n_k),
            in_specs=[
                pl.BlockSpec((1, C, chunk), lambda b, k: (b, 0, k)),
                pl.BlockSpec((1, 1, C), lambda b, k: (b, 0, 0)),
            ],
            out_specs=pl.BlockSpec((1, C, chunk), lambda b, k: (b, 0, k)),
        ),
        compiler_params=cparams,
        input_output_aliases={0: 0} if donate else {},
    )(x_flat, z)
    return out


# ---------------------------------- wrapper ----------------------------------

def se_attention(x, w1, w2, *, per_block_bytes=None, vmem_limit_bytes=None,
                 donate=False):
    """x: (B, C, H, W) NCHW.  w1: (MID, C), w2: (C, MID) — PyTorch Linear
    layout, no biases.  Returns x * sigmoid(relu(mean_hw(x) @ w1.T) @ w2.T)."""
    B, C, H, W = x.shape
    HW = H * W
    itemsize = jnp.dtype(x.dtype).itemsize

    auto_block, auto_limit = _chip_budgets()
    per_block_bytes = auto_block if per_block_bytes is None else per_block_bytes
    vmem_limit_bytes = auto_limit if vmem_limit_bytes is None else vmem_limit_bytes

    # Free views — no host-side padding, no output slicing (no extra HBM pass).
    x_flat = x.reshape(B, C, HW)
    # Pre-cast weights once in the wrapper (no per-step VPU cast work).
    w1t = w1.T.astype(jnp.float32)   # (C, MID)
    w2t = w2.T.astype(jnp.float32)   # (MID, C)

    per_elem_bytes = C * HW * itemsize
    if per_elem_bytes > per_block_bytes:
        # A single batch element does not fit one block: HW-chunked two-pass
        # pipeline (contiguous 128-multiple chunks stay at HBM roofline).
        out_flat = _se_chunked(x_flat, w1t, w2t, HW,
                               per_block_bytes, vmem_limit_bytes, donate)
        return out_flat.reshape(B, C, H, W)

    # Fused single-pass path.  Cap Bt at ceil(B/4) so the batch grid has >=2
    # steps whenever B >= 2 (work can split across TensorCores on v7x).
    Bt = int(max(1, min(B, per_block_bytes // per_elem_bytes, pl.cdiv(B, 4))))
    n_steps = pl.cdiv(B, Bt)   # partial last block -> Pallas-masked writes

    mid = w1.shape[0]
    cost = pl.CostEstimate(
        flops=2 * B * C * HW + 4 * B * C * mid,
        transcendentals=B * C,
        bytes_accessed=2 * B * C * HW * itemsize
        + n_steps * (w1t.size + w2t.size) * 4,
    )

    out_flat = pl.pallas_call(
        _make_fused_kernel(HW),
        out_shape=jax.ShapeDtypeStruct((B, C, HW), x.dtype),
        grid_spec=pltpu.PrefetchScalarGridSpec(
            num_scalar_prefetch=0,
            grid=(n_steps,),
            in_specs=[
                # Last two block dims equal the full array dims -> legal for
                # any (C, HW); only the final partial vreg per row is masked.
                pl.BlockSpec((Bt, C, HW), lambda b: (b, 0, 0)),
                pl.BlockSpec(w1t.shape, lambda b: (0, 0)),
                pl.BlockSpec(w2t.shape, lambda b: (0, 0)),
            ],
            out_specs=pl.BlockSpec((Bt, C, HW), lambda b: (b, 0, 0)),
        ),
        compiler_params=pltpu.CompilerParams(
            dimension_semantics=("parallel",),
            vmem_limit_bytes=vmem_limit_bytes,
        ),
        cost_estimate=cost,
        input_output_aliases={0: 0} if donate else {},
    )(x_flat, w1t, w2t)

    return out_flat.reshape(B, C, H, W)


def se_attention_ref(x, w1, w2):
    """Pure-JAX reference matching the PyTorch forward."""
    y = jnp.mean(x.astype(jnp.float32), axis=(2, 3))              # (B, C)
    h = jnp.maximum(y @ w1.T.astype(jnp.float32), 0.0)            # (B, MID)
    z = jax.nn.sigmoid(h @ w2.T.astype(jnp.float32))              # (B, C)
    return (x.astype(jnp.float32) * z[:, :, None, None]).astype(x.dtype)


if __name__ == "__main__":
    key = jax.random.PRNGKey(0)
    kx, k1, k2, kx2 = jax.random.split(key, 4)

    # Small shapes consistent with the module: channel=32, reduction=16 -> mid=2
    B, C, H, W = 2, 32, 16, 16
    reduction = 16
    MID = C // reduction

    x = jax.random.normal(kx, (B, C, H, W), dtype=jnp.float32)
    w1 = jax.random.normal(k1, (MID, C), dtype=jnp.float32) * 0.1
    w2 = jax.random.normal(k2, (C, MID), dtype=jnp.float32) * 0.1

    out = jax.block_until_ready(se_attention(x, w1, w2))
    ref = se_attention_ref(x, w1, w2)
    assert out.shape == (B, C, H, W)
    assert jnp.allclose(out, ref, atol=1e-5, rtol=1e-5), "fused path mismatch"

    # Also exercise the HW-chunked fallback (forced tiny block budget) on a
    # non-128-aligned spatial size so tail-chunk masking is covered.
    x2 = jax.random.normal(kx2, (B, C, 13, 13), dtype=jnp.float32)
    out2 = jax.block_until_ready(
        se_attention(x2, w1, w2, per_block_bytes=16 * 1024))
    ref2 = se_attention_ref(x2, w1, w2)
    assert jnp.allclose(out2, ref2, atol=1e-5, rtol=1e-5), "chunked path mismatch"

    print("KERNEL_OK")
</pallas_src>

<mosaic_0001>
module attributes {stable_mosaic.version = 11 : i64} {
  func.func @kernel(%arg0: i32, %arg1: memref<1x32x256xf32, #tpu.memory_space<vmem>>, %arg2: memref<32x2xf32, #tpu.memory_space<vmem>>, %arg3: memref<2x32xf32, #tpu.memory_space<vmem>>, %arg4: memref<1x32x256xf32, #tpu.memory_space<vmem>>) attributes {dimension_semantics = [#tpu.dimension_semantics<parallel>], iteration_bounds = array<i64: 2>, scalar_prefetch = 0 : i64, scratch_operands = 0 : i64, tpu.core_type = #tpu.core_type<tc>, window_params = [{transform_indices = @transform_0, window_bounds = array<i64: 1, 32, 256>}, {pipeline_mode = #tpu.pipeline_mode<synchronous>, transform_indices = @transform_1, window_bounds = array<i64: 32, 2>}, {pipeline_mode = #tpu.pipeline_mode<synchronous>, transform_indices = @transform_2, window_bounds = array<i64: 2, 32>}, {transform_indices = @transform_3, window_bounds = array<i64: 1, 32, 256>}]} {
    %c0 = arith.constant 0 : index
    %c0_0 = arith.constant 0 : index
    %c0_1 = arith.constant 0 : index
    %0 = vector.load %arg1[%c0, %c0_0, %c0_1] : memref<1x32x256xf32, #tpu.memory_space<vmem>>, vector<1x32x256xf32>
    %cst = arith.constant dense<0.000000e+00> : vector<1x32xf32>
    %1 = vector.multi_reduction <add>, %0, %cst [2] : vector<1x32x256xf32> to vector<1x32xf32>
    %cst_2 = arith.constant 3.906250e-03 : f32
    %2 = vector.broadcast %cst_2 : f32 to vector<1x32xf32>
    %3 = arith.mulf %1, %2 : vector<1x32xf32>
    %c0_3 = arith.constant 0 : index
    %c0_4 = arith.constant 0 : index
    %4 = vector.load %arg2[%c0_3, %c0_4] : memref<32x2xf32, #tpu.memory_space<vmem>>, vector<32x2xf32>
    %cst_5 = arith.constant dense<0.000000e+00> : vector<1x2xf32>
    %5 = tpu.matmul %3, %4, %cst_5 {dimension_numbers = #tpu.dot_dimension_numbers<[1], [0], [0], [1], [0, 0, 1, 1], [], []>} : vector<1x32xf32>, vector<32x2xf32>, vector<1x2xf32> -> vector<1x2xf32>
    %cst_6 = arith.constant 0.000000e+00 : f32
    %6 = vector.broadcast %cst_6 : f32 to vector<1x2xf32>
    %7 = arith.maximumf %5, %6 : vector<1x2xf32>
    %c0_7 = arith.constant 0 : index
    %c0_8 = arith.constant 0 : index
    %8 = vector.load %arg3[%c0_7, %c0_8] : memref<2x32xf32, #tpu.memory_space<vmem>>, vector<2x32xf32>
    %cst_9 = arith.constant dense<0.000000e+00> : vector<1x32xf32>
    %9 = tpu.matmul %7, %8, %cst_9 {dimension_numbers = #tpu.dot_dimension_numbers<[1], [0], [0], [1], [0, 0, 1, 1], [], []>} : vector<1x2xf32>, vector<2x32xf32>, vector<1x32xf32> -> vector<1x32xf32>
    %10 = arith.negf %9 : vector<1x32xf32>
    %11 = math.exp %10 : vector<1x32xf32>
    %cst_10 = arith.constant 1.000000e+00 : f32
    %12 = vector.broadcast %cst_10 : f32 to vector<1x32xf32>
    %13 = arith.addf %12, %11 : vector<1x32xf32>
    %14 = arith.divf %12, %13 : vector<1x32xf32>
    %15 = vector.shape_cast %14 : vector<1x32xf32> to vector<1x32x1xf32>
    %16 = vector.broadcast %15 : vector<1x32x1xf32> to vector<1x32x256xf32>
    %17 = arith.mulf %0, %16 : vector<1x32x256xf32>
    %c0_11 = arith.constant 0 : index
    %c0_12 = arith.constant 0 : index
    %c0_13 = arith.constant 0 : index
    %18 = vector.load %arg4[%c0_11, %c0_12, %c0_13] : memref<1x32x256xf32, #tpu.memory_space<vmem>>, vector<1x32x256xf32>
    tpu.vector_store %arg4[%c0_11, %c0_12, %c0_13], %17 {strides = array<i32>} : memref<1x32x256xf32, #tpu.memory_space<vmem>>, vector<1x32x256xf32>,
    return
  }
  func.func @transform_0(%arg0: i32) -> (i32, i32, i32) {
    %c0_i32 = arith.constant 0 : i32
    %c0_i32_0 = arith.constant 0 : i32
    %c0_i32_1 = arith.constant 0 : i32
    return %arg0, %c0_i32, %c0_i32_0 : i32, i32, i32
  }
  func.func @transform_1(%arg0: i32) -> (i32, i32) {
    %c0_i32 = arith.constant 0 : i32
    %c0_i32_0 = arith.constant 0 : i32
    %c0_i32_1 = arith.constant 0 : i32
    return %c0_i32, %c0_i32_0 : i32, i32
  }
  func.func @transform_2(%arg0: i32) -> (i32, i32) {
    %c0_i32 = arith.constant 0 : i32
    %c0_i32_0 = arith.constant 0 : i32
    %c0_i32_1 = arith.constant 0 : i32
    return %c0_i32, %c0_i32_0 : i32, i32
  }
  func.func @transform_3(%arg0: i32) -> (i32, i32, i32) {
    %c0_i32 = arith.constant 0 : i32
    %c0_i32_0 = arith.constant 0 : i32
    %c0_i32_1 = arith.constant 0 : i32
    return %arg0, %c0_i32, %c0_i32_0 : i32, i32, i32
  }
}

</mosaic_0001>

<bundles_post_ra>
// kernel: tpu_custom_call.1
= control target key start
LH: loop header
LB: loop body
LE: loop exit
PB: predicated region body
PF: predicated region fallthrough
CT: control target
= control target key end

     0   :  { %8 = vsyncpa [#allocation3], 0  ;;  %s975_s0 = inlined_call_operand.hbm [shape: f32[2,32,256], index: 0, kind: input, shape index: {}]   ;;  %s976_s1 = inlined_call_operand.vmem [shape: f32[32,2], index: 1, kind: input, shape index: {}]   ;;  %s977_s2 = inlined_call_operand.vmem [shape: f32[2,32], index: 2, kind: input, shape index: {}]   ;;  %s978_s3 = inlined_call_operand.hbm [shape: f32[2,32,256], index: 3, kind: output, shape index: {}]  }
   0x1   :  { %10 = vsyncpa [#allocation3 + $0x1], 0 }
   0x2   :  { %11 = vsyncpa [#allocation4], 0 }
   0x3   :  { %13 = vsyncpa [#allocation4 + $0x1], 0  ;;  %s762_s12 = smov 0   ;;  %s764_s13 = smov 0  }
   0x4   :  { %s766_s14 = smov 0   ;;  %s768_s15 = smov 0  }
   0x5 LB: > { %s783_s16 = sadd.s32 4294967295, %s731_s15   ;;  %s529_s17 = sadd.s32 4294967294, %s731_s15   ;;  %s731_s15 = sphi %s768_s15, %s991_s15   ;;  %s727_s14 = sphi %s766_s14, %s990_s14   ;;  %s723_s13 = sphi %s764_s13, %s989_s13   ;;  %s719_s12 = sphi %s762_s12, %s988_s12  }
   0x6   : > { %s787_s18 = sadd.s32 1, %s731_s15   ;;  %s26_s19 = sadd.s32 1, %s727_s14 }
   0x7   : > { %s23_s20 = ssub.s32 %s731_s15, %s787_s18  ;;  %p33_p0 = scmp.ne.s32.totalorder %s727_s14, %s723_s13 }
   0x8   : > { %p24_p1 = scmp.eq.s32.totalorder %s23_s20, 0  ;;  %p34_p2 = scmp.eq.s32.totalorder %s731_s15, 0 }
   0x9   : > { %p39_p3 = scmp.ne.s32.totalorder %s723_s13, %s719_s12  ;;  %p40_p4 = scmp.eq.s32.totalorder %s783_s16, 0 }
   0xa   : > { %s799_s21 = scalar_select %p24_p1, %s727_s14, %s26_s19  }
   0xb   : > { %p801_p5 = por %p34_p2, %p33_p0  ;;  %p805_p6 = por %p40_p4, %p39_p3 }
   0xc   : > { %p105_p7 = scmp.eq.s32.totalorder %s783_s16, 1  ;;  %p111_p8 = scmp.eq.s32.totalorder %s529_s17, 1 }
   0xd   : > { %p590_p10 = scmp.lt.s32.totalorder %s731_s15, 2  ;;  %s137_s26 = sand.u32 1, %s727_s14  }
   0xe   : > { %p812_p11 = por %p105_p7, %p33_p0  ;;  %p816_p12 = por %p111_p8, %p39_p3 }
   0xf   : > { %s547_s27 = sshll.u32 %s731_s15, 10  ;;  %s532_s28 = sshll.u32 %s137_s26, 6 }
  0x10   : > { %s982_s24 = scalar_select %p812_p11, 1, 0 }
  0x11   : > { %s983_s25 = scalar_select %p816_p12, 1, 0 }
  0x12   : > { %s825_s4 = scalar_lea.hbm %s975_s0, %s547_s27  ;;  %s141_s5 = scalar_lea.vmem [#allocation2], %s532_s28 }
  0x13   : > { %s148_s6 = sshll.u32 %s141_s5, 4  ;;  %p829_p13 = pnand %p590_p10, %p801_p5  ;;  %s833_s6 = int_to_ptr.vmem [resolvable:$true] %s148_s6 }
  0x14   : > { %s835_s8 = scalar_lea.sflag [#allocation3], %s137_s26  ;;  %s635_s9 = scalar_lea.hbm %s825_s4, 1024 }
  0x15   : > { %p636_p0 = scmp.ne.s32.totalorder %s825_s4, %s635_s9  ;;  %p637_p1 = pneg %p829_p13 }
  0x16   : > { %s640_s17 = scalar_lea.hbm %s975_s0, 2048  ;;  %p641_p4 = scmp.lt.u32.totalorder %s825_s4, %s975_s0 }
  0x17   : > { %p638_p2 = pnand %p637_p1, %p636_p0  ;;  %p642_p5 = scmp.lt.u32.totalorder %s640_s17, %s635_s9 }
  0x18   : > { %p644_p8 = scmp.lt.u32.totalorder %s635_s9, %s825_s4 }
  0x19   : > { %p639_p3 = pneg %p638_p2  ;;  %p643_p7 = por %p642_p5, %p641_p4 }
  0x1b   : > { %p645_p10 = por %p644_p8, %p643_p7 }
  0x1d   : > { %p646_p9 = pnand %p645_p10, %p639_p3 }
  0x1f   : > { %649 = shalt.err (!%p646_p9)
}
  0x20   : > { %s650_s22 = scalar_lea.vmem %s833_s6, 1024  ;;  %s733_s26 = smov [#allocation2]  }
  0x21   : > { %p651_p0 = scmp.ne.s32.totalorder %s833_s6, %s650_s22  ;;  %s655_s27 = sshll.u32 %s733_s26, 4  ;;  %s656_s27 = int_to_ptr.vmem [resolvable:$false] %s655_s27 }
  0x22   : > { %s657_s28 = scalar_lea.vmem %s656_s27, 2048  ;;  %p658_p11 = scmp.lt.s32.totalorder %s833_s6, %s656_s27 }
  0x23   : > { %p653_p2 = pnand %p651_p0, %p637_p1  ;;  %p659_p4 = scmp.lt.s32.totalorder %s657_s28, %s650_s22 }
  0x25   : > { %p654_p12 = pneg %p653_p2  ;;  %p660_p5 = por %p659_p4, %p658_p11 }
  0x27   : > { %p661_p7 = pnand %p660_p5, %p654_p12 }
  0x29   : > { %664 = shalt.err (!%p661_p7)
}
  0x2a   : > { %s734_s29 = smov 256   ;;  %s735_s30 = smov 16  }
  0x2b   : > { %585 = dma.hbm_to_vmem [thread:$0]  (!%p829_p13), %s825_s4, 1024, %s833_s6, %s835_s8, %s734_s29, %s734_s29, %s735_s30  }
  0x2c   : > { %p535_p9 = scmp.ge.s32.totalorder %s731_s15, 1  ;;  %p156_p1 = scmp.lt.s32.totalorder %s731_s15, 3 }
  0x2e   : > { %p157_p3 = pnand %p535_p9, %p156_p1 }
  0x2f   : > { %s866_s5 = sand.u32 (!%p157_p3), 1, %s723_s13  }
  0x30   : > { %160 = sbr.rel (%p157_p3) target bundleno = 806 (0x326), region = 32  ;;  %s536_s9 = sshll.u32 (!%p157_p3), %s866_s5, 6 }
  0x31   : > { %s163_s10 = scalar_lea.sflag (!%p157_p3), [#allocation3], %s866_s5  ;;  %s166_s11 = scalar_lea.vmem (!%p157_p3), [#allocation2], %s536_s9 }
  0x37   : > { %710 = dma.done.wait (%p805_p6), %s163_s10, 1024  }
  0x38   : > { %712 = vsyncadd (%p805_p6), %s163_s10, 4294966272  ;;  %v876_v0 = vld [vmem:[%s166_s11] sm:$0xff]  ;;  %v878_v1 = vld [vmem:[%s166_s11 + $0x8] sm:$0xff]  ;;  %v736_v15 = vmov 0.0|0.0   ;;  %vm737_vm0 = vmmov 0   ;;  %v738_v19 = vmov 0.0   ;;  %v221_v20 = vlaneseq }
  0x39   : > { %v880_v2 = vld [vmem:[%s166_s11 + $0x20] sm:$0xff]  ;;  %v197_v3 = vadd.f32 %v878_v1, %v876_v0  ;;  %v884_v4 = vld [vmem:[%s166_s11 + $0x28] sm:$0xff]  ;;  %v886_v5 = vld [vmem:[%s166_s11 + $0x10] sm:$0xff]  ;;  %572 = vmatprep.subr.bf16.mxu0 %v736_v15  ;;  %564 = vmatprep.mubr.msk.f32.mxu0 %vm737_vm0, %v738_v19  ;;  %vm232_vm1 = vcmask 130112   ;;  %vm239_vm2 = vcmask 195712   ;;  %vm246_vm3 = vcmask 261312  }
  0x3a   : > { %v888_v6 = vld [vmem:[%s166_s11 + $0x18] sm:$0xff]  ;;  %v203_v7 = vadd.f32 %v884_v4, %v880_v2  ;;  %v892_v8 = vld [vmem:[%s166_s11 + $0x30] sm:$0xff]  ;;  %v213_v12 = vld [vmem:[%s976_s1] sm:$0xff]  ;;  %567 = vmatprep.subr.mxu1 %v738_v19  ;;  %569 = vmatprep.mubr.msk.f32.mxu1 %vm737_vm0, %v738_v19  ;;  %v222_v21 = vand.u32 127, %v221_v20  ;;  %v224_v22 = vshrl.u32 %v221_v20, 7  ;;  %vm248_vm4 = vcmask 261120  }
  0x3b   : > { %v894_v9 = vld [vmem:[%s166_s11 + $0x38] sm:$0xff]  ;;  %198 = vadd.xlane.f32.xlu0 %v197_v3  ;;  %v200_v10 = vadd.f32 %v888_v6, %v886_v5  ;;  %v214_v13 = vld [vmem:[%s976_s1 + $0x8] sm:$0xff]  ;;  %v215_v16 = vld [vmem:[%s976_s1 + $0x10] sm:$0xff]  ;;  %vm327_vm5 = vcmask 1041408   ;;  %vm323_vm6 = vcmask 15360   ;;  %s188_s27 = scalar_lea.vmem [#allocation5], %s536_s9 }
  0x3c   : > { %204 = vadd.xlane.f32.xlu1 %v203_v7  ;;  %v206_v11 = vadd.f32 %v894_v9, %v892_v8  ;;  %v573_v14 = vpack.c.bf16 %v214_v13, %v213_v12  ;;  %v216_v17 = vld [vmem:[%s976_s1 + $0x18] sm:$0xff]  ;;  %v227_v23 = vadd.s32 4294967288, %v222_v21  ;;  %v234_v25 = vadd.s32 4294967280, %v222_v21  ;;  %v322_v45 = vld [vmem:[%s977_s2] sm:$0x3]  ;;  %s456_s28 = sshll.u32 %s188_s27, 4  ;;  %s924_s28 = int_to_ptr.vmem [resolvable:$true] %s456_s28 }
  0x3d   : > { %v576_v18 = vpack.c.bf16 %v216_v17, %v215_v16  ;;  %v241_v26 = vadd.s32 4294967272, %v222_v21  ;;  %v225_v28 = vsub.s32 %v222_v21, %v224_v22  ;;  %568 = vmatpush3.msk.msra.mxu1 %vm327_vm5, %v322_v45  ;;  %v409_v54 = vsub.s32 0, %v224_v22  ;;  %s548_s29 = sshll.u32 %s783_s16, 10  ;;  %s443_s16 = scalar_lea.sflag [#allocation4], %s866_s5 }
  0x3e   : > { %574 = vmatpush3.bf16.msra.mxu0 %v573_v14  ;;  %v230_v30 = vsub.s32 %v227_v23, %v224_v22  ;;  %v237_v31 = vsub.s32 %v234_v25, %v224_v22  ;;  %s929_s10 = scalar_lea.hbm %s978_s3, %s548_s29  ;;  %s665_s11 = scalar_lea.vmem %s924_s28, 1024 }
  0x3f   : > { %201 = vadd.xlane.f32.xlu0 %v200_v10  ;;  %575 = vmatprep.subr.bf16.mxu0 %v736_v15  ;;  %v244_v34 = vsub.s32 %v241_v26, %v224_v22  ;;  %p666_p6 = scmp.ne.s32.totalorder %s924_s28, %s665_s11  ;;  %p985_p11 = scmp.ne.s32.totalorder %s982_s24, 0 }
  0x40   : > { %207 = vadd.xlane.f32.xlu1 %v206_v11  ;;  %s739_s23 = smov [#allocation5]  }
  0x41   : > { %p667_p12 = pnand %p666_p6, %p985_p11  ;;  %s669_s4 = sshll.u32 %s739_s23, 4  ;;  %s670_s4 = int_to_ptr.vmem [resolvable:$false] %s669_s4 }
  0x42   : > { %577 = vmatpush3.bf16.msra.mxu0 %v576_v18  ;;  %s671_s6 = scalar_lea.vmem %s670_s4, 2048  ;;  %p672_p8 = scmp.lt.s32.totalorder %s924_s28, %s670_s4 }
  0x43   : > { %p668_p13 = pneg %p667_p12  ;;  %p673_p10 = scmp.lt.s32.totalorder %s671_s6, %s665_s11 }
  0x45   : > { %p674_p0 = por %p673_p10, %p672_p8 }
  0x47   : > { %p675_p2 = pnand %p674_p0, %p668_p13 }
  0xc8   : > { %v199_v24 = vpop.xlane.xlu0 %198 }
  0xc9   : > { %v205_v27 = vpop.xlane.xlu1 %204  ;;  %v209_v29 = vmul.f32 0.00390625, %v199_v24 }
  0xca   : > { %v211_v32 = vmul.f32 0.00390625, %v205_v27 }
  0xcb   : > { %v226_v38 = vrot.slane %v209_v29, %v225_v28 }
  0xcc   : > { %v202_v33 = vpop.xlane.xlu0 %201  ;;  %v238_v40 = vrot.slane %v211_v32, %v237_v31 }
  0xcd   : > { %v210_v35 = vmul.f32 0.00390625, %v202_v33  ;;  %v208_v36 = vpop.xlane.xlu1 %207 }
  0xce   : > { %v212_v37 = vmul.f32 0.00390625, %v208_v36 }
  0xcf   : > { %v231_v39 = vrot.slane %v210_v35, %v230_v30 }
  0xd0   : > { %v245_v41 = vrot.slane %v212_v37, %v244_v34 }
  0xd1   : > { %v233_v42 = vsel %vm232_vm1, %v231_v39, %v226_v38 }
  0xd2   : > { %v240_v43 = vsel %vm239_vm2, %v238_v40, %v233_v42 }
  0xd3   : > { %v247_v44 = vsel %vm246_vm3, %v245_v41, %v240_v43 }
  0xd4   : > { %565 = vmatmul.mubr.msk.f32.vlgmr.msra.gmra.mrb[0].mxu0 %vm248_vm4, %v247_v44 }
 0x1a7   : > { %v317_v46 = vpop.f32.mrb[0].mxu0 }
 0x1a8   : > { %v321_v47 = vmax.f32 %v317_v46, 0.0  ;;  %v566_v48 = vpop.f32.mrb[1].mxu0 }
 0x1aa   : > { %570 = vmatmul.mubr.msk.f32.vlgmr.msra.gmra.mrb[0].mxu1 %vm323_vm6, %v321_v47 }
 0x27d   : > { %v397_v49 = vpop.f32.mrb[0].mxu1 }
 0x27e   : > { %v541_v50 = vmul.f32 -1.442695, %v397_v49  ;;  %v571_v51 = vpop.f32.mrb[1].mxu1 }
 0x280   : > { %631 = vpow2.f32 %v541_v50 }
 0x28a   : > { %v632_v52 = vpop.eup %631 }
 0x28b   : > { %v404_v53 = vadd.f32 1.0, %v632_v52 }
 0x28d   : > { %633 = vrcp.f32 %v404_v53 }
 0x297   : > { %v634_v55 = vpop.eup %633 }
 0x298   : > { %v410_v56 = vrot.slane %v634_v55, %v409_v54 }
 0x29a   : > { %416 = vbcast.lane.b32.xlu1 %v410_v56, 264  ;;  %412 = vbcast.lane.b32.xlu0 %v410_v56, 256 }
 0x29e   : > { %420 = vbcast.lane.b32.xlu1 %v410_v56, 272 }
 0x2a2   : > { %424 = vbcast.lane.b32.xlu1 %v410_v56, 280 }
 0x30c   : > { %v417_v57 = vpop.permute.xlu1 %416  ;;  %v413_v58 = vpop.permute.xlu0 %412 }
 0x30d   : > { %v428_v59 = vmul.f32 %v417_v57, %v886_v5  ;;  %v429_v60 = vmul.f32 %v417_v57, %v888_v6  ;;  %v426_v61 = vmul.f32 %v413_v58, %v876_v0  ;;  %v427_v62 = vmul.f32 %v413_v58, %v878_v1 }
 0x30f   : > { %436 = vst [vmem:[%s188_s27 + $0x10] sm:$0xff] %v428_v59  ;;  %437 = vst [vmem:[%s188_s27 + $0x18] sm:$0xff] %v429_v60 }
 0x310   : > { %434 = vst [vmem:[%s188_s27] sm:$0xff] %v426_v61  ;;  %435 = vst [vmem:[%s188_s27 + $0x8] sm:$0xff] %v427_v62  ;;  %v421_v63 = vpop.permute.xlu1 %420 }
 0x311   : > { %v430_v3 = vmul.f32 %v421_v63, %v880_v2  ;;  %v431_v5 = vmul.f32 %v421_v63, %v884_v4 }
 0x313   : > { %438 = vst [vmem:[%s188_s27 + $0x20] sm:$0xff] %v430_v3  ;;  %439 = vst [vmem:[%s188_s27 + $0x28] sm:$0xff] %v431_v5 }
 0x314   : > { %v425_v0 = vpop.permute.xlu1 %424 }
 0x315   : > { %v432_v1 = vmul.f32 %v425_v0, %v892_v8  ;;  %v433_v2 = vmul.f32 %v425_v0, %v894_v9 }
 0x317   : > { %440 = vst [vmem:[%s188_s27 + $0x30] sm:$0xff] %v432_v1  ;;  %441 = vst [vmem:[%s188_s27 + $0x38] sm:$0xff] %v433_v2 }
 0x318   : > { %678 = shalt.err (!%p675_p2)
}
 0x319   : > { %s679_s7 = scalar_lea.hbm %s929_s10, 1024  ;;  %s683_s19 = scalar_lea.hbm %s978_s3, 2048 }
 0x31a   : > { %p680_p4 = scmp.ne.s32.totalorder %s929_s10, %s679_s7  ;;  %p684_p9 = scmp.lt.u32.totalorder %s929_s10, %s978_s3 }
 0x31b   : > { %p685_p1 = scmp.lt.u32.totalorder %s683_s19, %s679_s7  ;;  %p687_p6 = scmp.lt.u32.totalorder %s679_s7, %s929_s10 }
 0x31c   : > { %p681_p5 = pnand %p680_p4, %p985_p11 }
 0x31d   : > { %p686_p3 = por %p685_p1, %p684_p9 }
 0x31e   : > { %p682_p7 = pneg %p681_p5 }
 0x31f   : > { %p688_p12 = por %p687_p6, %p686_p3 }
 0x321   : > { %p689_p13 = pnand %p688_p12, %p682_p7 }
 0x323   : > { %692 = shalt.err (!%p689_p13)
}
 0x324   : > { %s740_s26 = smov 256   ;;  %s741_s27 = smov 16  }
 0x325   : > { %580 = dma.vmem_to_hbm [thread:$0]  (%p985_p11), %s924_s28, 1024, %s929_s10, %s443_s16, %s740_s26, %s740_s26, %s741_s27  }
 0x326 PF: > { %s471_s29 = sand.u32 1, %s719_s12   ;;  %p986_p8 = scmp.ne.s32.totalorder %s983_s25, 0 }
 0x327   : > { %p987_p10 = scmp.ge.s32.totalorder %s731_s15, 2  ;;  %s472_s30 = scalar_lea.sflag [#allocation4], %s471_s29 }
 0x329   : > { %p587_p0 = pnand %p987_p10, %p986_p8 }
 0x32b   : > { %714 = dma.done.wait (!%p587_p0), %s472_s30, 1024  }
 0x32c   : > { %716 = vsyncadd (!%p587_p0), %s472_s30, 4294966272  ;;  %p16_p2 = scmp.ge.s32.totalorder %s787_s18, 4   ;;  %s988_s12 = smov %s723_s13 }
 0x32d   : > { %s989_s13 = smov %s727_s14  ;;  %s990_s14 = smov %s799_s21 }
 0x32e   : > { %s991_s15 = smov %s787_s18  ;;  %18 = sbr.rel (!%p16_p2) target bundleno = 5 (0x5), region = 77 }
 0x335   :  { %477 = vsyncpa [#allocation3], 1 }
 0x336   :  { %479 = vsyncpa [#allocation3 + $0x1], 1 }
 0x337   :  { %480 = vsyncpa [#allocation4], 1 }
 0x338   :  { %482 = vsyncpa [#allocation4 + $0x1], 1 }

</bundles_post_ra>
